<compile_context>
chip_gen: v7x
topology: tpu7x:2x2x1
jax: 0.10.0
libtpu: 0.0.40
codegen_flags: <defaults>
</compile_context>

<pallas_src>
import jax
import jax.numpy as jnp
from jax.experimental import pallas as pl
from jax.experimental.pallas import tpu as pltpu

INPUT_SIZE = 5
HIDDEN_SIZES = [10, 20, 10]
OUTPUT_SIZE = 1
SIZES = [INPUT_SIZE] + HIDDEN_SIZES + [OUTPUT_SIZE]


def _round_up(x, m):
    return (x + m - 1) // m * m


# Static packing layout for the parameter slab: each layer occupies an 8-aligned row block of
# [W (out,in) | b (out,1)]; lane width padded to 128.
_LAYER_ROWS = []
_off = 0
for _fan_in, _fan_out in zip(SIZES[:-1], SIZES[1:]):
    _LAYER_ROWS.append((_off, _fan_out, _fan_in))
    _off = _round_up(_off + _fan_out, 8)
PARAM_ROWS = _round_up(_off, 8)                              # 64
PARAM_COLS = _round_up(max(SIZES[:-1]) + 1, 128)             # 128


def greedy_mlp_kernel(p_ref, x_ref, out_ref):
    # p_ref:   (PARAM_ROWS, PARAM_COLS) packed [W|b] slab, VMEM-resident across the grid.
    # x_ref:   (INPUT_SIZE, TB)  -- features on sublanes, batch on lanes.
    # out_ref: (OUTPUT_SIZE, TB) -- lane-dense output store.
    h = x_ref[...]
    n_layers = len(_LAYER_ROWS)
    for li, (r0, fan_out, fan_in) in enumerate(_LAYER_ROWS):
        w = p_ref[r0:r0 + fan_out, 0:fan_in]                 # (out, in), static slice
        b = p_ref[r0:r0 + fan_out, fan_in:fan_in + 1]        # (out, 1),  static slice
        h = jnp.dot(w, h, preferred_element_type=jnp.float32) + b
        if li < n_layers - 1:
            h = jnp.maximum(h, 0.0)
    out_ref[...] = h.astype(out_ref.dtype)


def pack_params(params):
    """params: list of (W, b) with W (in, out), b (1, out). Returns one f32 slab."""
    slab = jnp.zeros((PARAM_ROWS, PARAM_COLS), jnp.float32)
    for (r0, fan_out, fan_in), (W, b) in zip(_LAYER_ROWS, params):
        slab = slab.at[r0:r0 + fan_out, 0:fan_in].set(W.T.astype(jnp.float32))
        slab = slab.at[r0:r0 + fan_out, fan_in:fan_in + 1].set(b.T.astype(jnp.float32))
    return slab


def greedy_mlp(x, params, *, tb=512):
    """x: (B, INPUT_SIZE) float32. params: list of (W, b) with W (in, out), b (1, out)."""
    B = x.shape[0]
    slab = pack_params(params)

    # Batch tile (lane width). >=128 for lane density, capped by the padded batch.
    TB = max(128, min(tb, _round_up(B, 128)))
    B_pad = _round_up(B, TB)

    # Flip to batch-on-lanes layout and zero-pad the batch to a whole number of tiles.
    xT = jnp.zeros((INPUT_SIZE, B_pad), jnp.float32).at[:, :B].set(x.T.astype(jnp.float32))

    out = pl.pallas_call(
        greedy_mlp_kernel,
        out_shape=jax.ShapeDtypeStruct((OUTPUT_SIZE, B_pad), jnp.float32),
        grid=(B_pad // TB,),
        in_specs=[
            pl.BlockSpec((PARAM_ROWS, PARAM_COLS), lambda i: (0, 0)),  # params stay resident
            pl.BlockSpec((INPUT_SIZE, TB), lambda i: (0, i)),          # streamed batch tiles
        ],
        out_specs=pl.BlockSpec((OUTPUT_SIZE, TB), lambda i: (0, i)),
        compiler_params=pltpu.CompilerParams(
            dimension_semantics=("parallel",),
        ),
    )(slab, xT)

    return out[:, :B].T                                       # back to (B, OUTPUT_SIZE)


def init_params(key):
    """Deterministic init mimicking nn.Linear's uniform(-1/sqrt(fan_in), 1/sqrt(fan_in))."""
    params = []
    for fan_in, fan_out in zip(SIZES[:-1], SIZES[1:]):
        kw, kb, key = jax.random.split(key, 3)
        bound = 1.0 / (fan_in ** 0.5)
        W = jax.random.uniform(kw, (fan_in, fan_out), jnp.float32, -bound, bound)
        b = jax.random.uniform(kb, (1, fan_out), jnp.float32, -bound, bound)
        params.append((W, b))
    return params


def reference_mlp(x, params):
    h = x
    for (W, b) in params[:-1]:
        h = jnp.maximum(jnp.dot(h, W) + b, 0.0)
    Wo, bo = params[-1]
    return jnp.dot(h, Wo) + bo


if __name__ == "__main__":
    key = jax.random.PRNGKey(0)
    kx, kx2, kp = jax.random.split(key, 3)
    params = init_params(kp)

    # Small-batch check (single grid step, padded to one 128-lane tile).
    batch = 8
    x = jax.random.normal(kx, (batch, INPUT_SIZE), jnp.float32)
    out = jax.block_until_ready(greedy_mlp(x, params))
    ref = reference_mlp(x, params)
    assert out.shape == (batch, OUTPUT_SIZE)
    assert jnp.allclose(out, ref, atol=1e-5, rtol=1e-5), (out, ref)

    # Multi-tile check (exercises the batch grid + partial-tile padding).
    batch2 = 300
    x2 = jax.random.normal(kx2, (batch2, INPUT_SIZE), jnp.float32)
    out2 = jax.block_until_ready(greedy_mlp(x2, params, tb=128))
    ref2 = reference_mlp(x2, params)
    assert out2.shape == (batch2, OUTPUT_SIZE)
    assert jnp.allclose(out2, ref2, atol=1e-5, rtol=1e-5)

    print("KERNEL_OK")
</pallas_src>

<mosaic_0001>
module attributes {stable_mosaic.version = 11 : i64} {
  func.func @greedy_mlp_kernel(%arg0: i32, %arg1: memref<64x128xf32, #tpu.memory_space<vmem>>, %arg2: memref<5x128xf32, #tpu.memory_space<vmem>>, %arg3: memref<1x128xf32, #tpu.memory_space<vmem>>) attributes {dimension_semantics = [#tpu.dimension_semantics<parallel>], iteration_bounds = array<i64: 1>, scalar_prefetch = 0 : i64, scratch_operands = 0 : i64, tpu.core_type = #tpu.core_type<tc>, window_params = [{pipeline_mode = #tpu.pipeline_mode<synchronous>, transform_indices = @transform_0, window_bounds = array<i64: 64, 128>}, {transform_indices = @transform_1, window_bounds = array<i64: 5, 128>}, {transform_indices = @transform_2, window_bounds = array<i64: 1, 128>}]} {
    %c0 = arith.constant 0 : index
    %c0_0 = arith.constant 0 : index
    %0 = vector.load %arg2[%c0, %c0_0] : memref<5x128xf32, #tpu.memory_space<vmem>>, vector<5x128xf32>
    %c0_1 = arith.constant 0 : index
    %c0_2 = arith.constant 0 : index
    %1 = vector.load %arg1[%c0_1, %c0_2] : memref<64x128xf32, #tpu.memory_space<vmem>>, vector<10x5xf32>
    %c0_3 = arith.constant 0 : index
    %c5 = arith.constant 5 : index
    %2 = vector.load %arg1[%c0_3, %c5] : memref<64x128xf32, #tpu.memory_space<vmem>>, vector<10x1xf32>
    %cst = arith.constant dense<0.000000e+00> : vector<10x128xf32>
    %3 = tpu.matmul %1, %0, %cst {dimension_numbers = #tpu.dot_dimension_numbers<[1], [0], [0], [1], [0, 0, 1, 1], [], []>} : vector<10x5xf32>, vector<5x128xf32>, vector<10x128xf32> -> vector<10x128xf32>
    %4 = vector.broadcast %2 : vector<10x1xf32> to vector<10x128xf32>
    %5 = arith.addf %3, %4 : vector<10x128xf32>
    %cst_4 = arith.constant 0.000000e+00 : f32
    %6 = vector.broadcast %cst_4 : f32 to vector<10x128xf32>
    %7 = arith.maximumf %5, %6 : vector<10x128xf32>
    %c16 = arith.constant 16 : index
    %c0_5 = arith.constant 0 : index
    %8 = vector.load %arg1[%c16, %c0_5] : memref<64x128xf32, #tpu.memory_space<vmem>>, vector<20x10xf32>
    %c16_6 = arith.constant 16 : index
    %c10 = arith.constant 10 : index
    %9 = vector.load %arg1[%c16_6, %c10] : memref<64x128xf32, #tpu.memory_space<vmem>>, vector<20x1xf32>
    %cst_7 = arith.constant dense<0.000000e+00> : vector<20x128xf32>
    %10 = tpu.matmul %8, %7, %cst_7 {dimension_numbers = #tpu.dot_dimension_numbers<[1], [0], [0], [1], [0, 0, 1, 1], [], []>} : vector<20x10xf32>, vector<10x128xf32>, vector<20x128xf32> -> vector<20x128xf32>
    %11 = vector.broadcast %9 : vector<20x1xf32> to vector<20x128xf32>
    %12 = arith.addf %10, %11 : vector<20x128xf32>
    %cst_8 = arith.constant 0.000000e+00 : f32
    %13 = vector.broadcast %cst_8 : f32 to vector<20x128xf32>
    %14 = arith.maximumf %12, %13 : vector<20x128xf32>
    %c40 = arith.constant 40 : index
    %c0_9 = arith.constant 0 : index
    %15 = vector.load %arg1[%c40, %c0_9] : memref<64x128xf32, #tpu.memory_space<vmem>>, vector<10x20xf32>
    %c40_10 = arith.constant 40 : index
    %c20 = arith.constant 20 : index
    %16 = vector.load %arg1[%c40_10, %c20] : memref<64x128xf32, #tpu.memory_space<vmem>>, vector<10x1xf32>
    %cst_11 = arith.constant dense<0.000000e+00> : vector<10x128xf32>
    %17 = tpu.matmul %15, %14, %cst_11 {dimension_numbers = #tpu.dot_dimension_numbers<[1], [0], [0], [1], [0, 0, 1, 1], [], []>} : vector<10x20xf32>, vector<20x128xf32>, vector<10x128xf32> -> vector<10x128xf32>
    %18 = vector.broadcast %16 : vector<10x1xf32> to vector<10x128xf32>
    %19 = arith.addf %17, %18 : vector<10x128xf32>
    %cst_12 = arith.constant 0.000000e+00 : f32
    %20 = vector.broadcast %cst_12 : f32 to vector<10x128xf32>
    %21 = arith.maximumf %19, %20 : vector<10x128xf32>
    %c56 = arith.constant 56 : index
    %c0_13 = arith.constant 0 : index
    %22 = vector.load %arg1[%c56, %c0_13] : memref<64x128xf32, #tpu.memory_space<vmem>>, vector<1x10xf32>
    %c56_14 = arith.constant 56 : index
    %c10_15 = arith.constant 10 : index
    %23 = vector.load %arg1[%c56_14, %c10_15] : memref<64x128xf32, #tpu.memory_space<vmem>>, vector<1x1xf32>
    %cst_16 = arith.constant dense<0.000000e+00> : vector<1x128xf32>
    %24 = tpu.matmul %22, %21, %cst_16 {dimension_numbers = #tpu.dot_dimension_numbers<[1], [0], [0], [1], [0, 0, 1, 1], [], []>} : vector<1x10xf32>, vector<10x128xf32>, vector<1x128xf32> -> vector<1x128xf32>
    %25 = vector.broadcast %23 : vector<1x1xf32> to vector<1x128xf32>
    %26 = arith.addf %24, %25 : vector<1x128xf32>
    %c0_17 = arith.constant 0 : index
    %c0_18 = arith.constant 0 : index
    %27 = vector.load %arg3[%c0_17, %c0_18] : memref<1x128xf32, #tpu.memory_space<vmem>>, vector<1x128xf32>
    tpu.vector_store %arg3[%c0_17, %c0_18], %26 {strides = array<i32>} : memref<1x128xf32, #tpu.memory_space<vmem>>, vector<1x128xf32>,
    return
  }
  func.func @transform_0(%arg0: i32) -> (i32, i32) {
    %c0_i32 = arith.constant 0 : i32
    %c0_i32_0 = arith.constant 0 : i32
    %c0_i32_1 = arith.constant 0 : i32
    return %c0_i32, %c0_i32_0 : i32, i32
  }
  func.func @transform_1(%arg0: i32) -> (i32, i32) {
    %c0_i32 = arith.constant 0 : i32
    %c0_i32_0 = arith.constant 0 : i32
    return %c0_i32, %arg0 : i32, i32
  }
  func.func @transform_2(%arg0: i32) -> (i32, i32) {
    %c0_i32 = arith.constant 0 : i32
    %c0_i32_0 = arith.constant 0 : i32
    return %c0_i32, %arg0 : i32, i32
  }
}

</mosaic_0001>

<bundles_post_ra>
// kernel: tpu_custom_call.1
= control target key start
LH: loop header
LB: loop body
LE: loop exit
PB: predicated region body
PF: predicated region fallthrough
CT: control target
= control target key end

     0   :  { %7 = vsyncpa [#allocation3], 0  ;;  %s698_s0 = inlined_call_operand.hbm [shape: f32[64,128], index: 0, kind: input, shape index: {}]   ;;  %s699_s1 = inlined_call_operand.hbm [shape: f32[5,128], index: 1, kind: input, shape index: {}]   ;;  %s700_s2 = inlined_call_operand.hbm [shape: f32[1,128], index: 2, kind: output, shape index: {}]  }
   0x1   :  { %8 = vsyncpa [#allocation6], 0 }
   0x2   :  { %9 = vsyncpa [#allocation4], 0  ;;  %s607_s9 = smov [#allocation2]   ;;  %s535_s13 = scalar_lea.hbm %s698_s0, 1024 }
   0x3   :  { %s15_s10 = sshll.u32 %s607_s9, 4  ;;  %p536_p0 = scmp.ne.s32.totalorder %s698_s0, %s535_s13  ;;  %s16_s10 = int_to_ptr.vmem [resolvable:$true] %s15_s10 }
   0x4   :  { %p539_p1 = scmp.lt.u32.totalorder %s535_s13, %s698_s0 }
   0x6   :  { %p541_p2 = pnand %p539_p1, %p536_p0 }
   0x8   :  { %544 = shalt.err (!%p541_p2)
}
   0x9   :  { %s545_s18 = scalar_lea.vmem %s16_s10, 1024  ;;  %p550_p4 = scmp.lt.s32.totalorder %s16_s10, %s16_s10 }
   0xa   :  { %p546_p3 = scmp.ne.s32.totalorder %s16_s10, %s545_s18  ;;  %p551_p5 = scmp.lt.s32.totalorder %s545_s18, %s545_s18 }
   0xc   :  { %p552_p6 = por %p551_p5, %p550_p4 }
   0xe   :  { %p553_p7 = pnand %p552_p6, %p546_p3 }
  0x10   :  { %556 = shalt.err (!%p553_p7)
}
  0x11   :  { %s608_s19 = smov 128   ;;  %s609_s20 = smov 8  }
  0x12   :  { %21 = dma.hbm_to_vmem [thread:$0]  %s698_s0, 1024, %s16_s10, [#allocation3], %s608_s19, %s608_s19, %s609_s20  }
  0x13   :  { %s610_s23 = smov [#allocation5]   ;;  %s557_s27 = scalar_lea.hbm %s699_s1, 128 }
  0x14   :  { %s28_s24 = sshll.u32 %s610_s23, 4  ;;  %p558_p8 = scmp.ne.s32.totalorder %s699_s1, %s557_s27  ;;  %s29_s24 = int_to_ptr.vmem [resolvable:$true] %s28_s24 }
  0x15   :  { %p561_p9 = scmp.lt.u32.totalorder %s557_s27, %s699_s1 }
  0x17   :  { %p563_p10 = pnand %p561_p9, %p558_p8 }
  0x19   :  { %566 = shalt.err (!%p563_p10)
}
  0x1a   :  { %s567_s4 = scalar_lea.vmem %s29_s24, 128  ;;  %p572_p12 = scmp.lt.s32.totalorder %s29_s24, %s29_s24 }
  0x1b   :  { %p568_p11 = scmp.ne.s32.totalorder %s29_s24, %s567_s4  ;;  %p573_p13 = scmp.lt.s32.totalorder %s567_s4, %s567_s4 }
  0x1d   :  { %p574_p0 = por %p573_p13, %p572_p12 }
  0x1f   :  { %p575_p1 = pnand %p574_p0, %p568_p11 }
  0x21   :  { %578 = shalt.err (!%p575_p1)
}
  0x22   :  { %31 = dma.hbm_to_vmem [thread:$0]  %s699_s1, 128, %s29_s24, [#allocation6]  }
  0x23   :  { %601 = dma.done.wait [#allocation3], 1024  }
  0x24   :  { %602 = vsyncadd [#allocation3], 4294966272 }
  0x25   :  { %603 = dma.done.wait [#allocation6], 128  }
  0x26   :  { %604 = vsyncadd [#allocation6], 4294967168  ;;  %v611_v0 = vmov 5   ;;  %vm56_vm0 = vcmask 1044480   ;;  %vm51_vm1 = vcmask 39936   ;;  %v39_v2 = vld [vmem:[#allocation2] sm:$0xff] }
  0x27   :  { %531 = vset.pattern.permute.xlu0 %v611_v0  ;;  %v38_v1 = vld [vmem:[#allocation5] sm:$0x1f]  ;;  %v40_v3 = vld [vmem:[#allocation2 + $0x8] sm:$0x3]  ;;  %475 = vmatprep.mubr.msk.f32.mxu0 %vm51_vm1, %v39_v2  ;;  %v612_v4 = vmov 0.0|0.0   ;;  %vm613_vm2 = vmmov 0  }
  0x28   :  { %473 = vmatprep.subr.msk.mxu0 %vm56_vm0, %v38_v1  ;;  %43 = vperm.xlu0 %531, %v39_v2   ;;  %v614_v5 = vmov 0.0   ;;  %v137_v6 = vld [vmem:[#allocation2 + $0x10] sm:$0xff]  ;;  %v139_v7 = vld [vmem:[#allocation2 + $0x20] sm:$0xf]  ;;  %v615_v8 = vmov 10   ;;  %v138_v10 = vld [vmem:[#allocation2 + $0x18] sm:$0xff] }
  0x29   :  { %474 = vmatpush3.msk.msra.mxu0 %vm56_vm0, %v38_v1  ;;  %507 = vmatprep.subr.bf16.mxu1 %v612_v4  ;;  %v661_v9 = vld [vmem:[#allocation2 + $0x38] sm:$0x1]  ;;  %vm162_vm3 = vcmask 1041408   ;;  %vm616_vm4 = vmmov 1   ;;  %vm155_vm6 = vcmask 80896   ;;  %v249_v21 = vld [vmem:[#allocation2 + $0x28] sm:$0xff] }
  0x2a   :  { %476 = vmatmul.mubr.msk.f32.vlgmr.msra.gmra.mrb[0].mxu0 %vm51_vm1, %v40_v3  ;;  %482 = vmatprep.mubr.msk.f32.mxu1 %vm613_vm2, %v614_v5  ;;  %vm664_vm5 = vmpackc.low %vm162_vm3, %vm616_vm4  ;;  %vm261_vm7 = vcmask 162816   ;;  %v617_v22 = vmov 20   ;;  %v250_v23 = vld [vmem:[#allocation2 + $0x30] sm:$0x3]  ;;  %vm266_vm8 = vcmask 1043456   ;;  %s618_s1 = smov [#allocation7]  }
  0x2b   :  { %532 = vset.pattern.permute.xlu1 %v615_v8  ;;  %497 = vmatprep.mubr.msk.f32.mxu0 %vm261_vm7, %v249_v21  ;;  %s435_s6 = sshll.u32 %s618_s1, 4  ;;  %s436_s6 = int_to_ptr.vmem [resolvable:$true] %s435_s6 }
  0x2c   :  { %48 = vperm.xlu0 %531, %v40_v3   ;;  %142 = vperm.xlu1 %532, %v137_v6   ;;  %s579_s7 = scalar_lea.vmem %s436_s6, 16  ;;  %s583_s8 = scalar_lea.vmem %s436_s6, 32 }
  0x2d   :  { %p580_p2 = scmp.ne.s32.totalorder %s436_s6, %s579_s7  ;;  %p584_p3 = scmp.lt.s32.totalorder %s436_s6, %s436_s6 }
  0x2e   :  { %p585_p4 = scmp.lt.s32.totalorder %s583_s8, %s579_s7 }
  0x30   :  { %533 = vset.pattern.permute.xlu0 %v615_v8  ;;  %147 = vperm.xlu1 %532, %v138_v10   ;;  %p586_p5 = por %p585_p4, %p584_p3 }
  0x31   :  { %152 = vperm.xlu0 %533, %v139_v7  }
  0x32   :  { %p587_p6 = pnand %p586_p5, %p580_p2 }
  0x34   :  { %534 = vset.pattern.permute.xlu1 %v617_v22 }
  0x35   :  { %350 = vperm.xlu0 %533, %v661_v9   ;;  %253 = vperm.xlu1 %534, %v249_v21  }
  0x39   :  { %258 = vperm.xlu1 %534, %v250_v23  }
  0xa7   :  { %v44_v11 = vpop.permute.xlu0 %43 }
  0xab   :  { %v49_v12 = vpop.permute.xlu0 %48  ;;  %v143_v24 = vpop.permute.xlu1 %142 }
  0xaf   :  { %v148_v28 = vpop.permute.xlu1 %147 }
  0xb0   :  { %v153_v34 = vpop.permute.xlu0 %152 }
  0xb4   :  { %v254_v40 = vpop.permute.xlu1 %253  ;;  %v351_v49 = vpop.permute.xlu0 %350 }
  0xb8   :  { %v259_v41 = vpop.permute.xlu1 %258 }
  0xfd   :  { %v477_v13 = vpop.f32.mrb[0].mxu0 }
  0xfe   :  { %v132_v14 = vadd.f32 %v477_v13, %v49_v12  ;;  %v126_v15 = vpop.f32.mrb[1].mxu0 }
  0xff   :  { %v127_v16 = vadd.f32 %v126_v15, %v44_v11 }
 0x100   :  { %v136_v17 = vmax.f32 %v132_v14, 0.0 }
 0x101   :  { %v135_v18 = vmax.f32 %v127_v16, 0.0 }
 0x103   :  { %v508_v20 = vpack.c.bf16 %v136_v17, %v135_v18 }
 0x105   :  { %510 = vmatpush3.bf16.msk.msra.mxu1 %vm664_vm5, %v508_v20 }
 0x108   :  { %483 = vmatmul.mubr.msk.f32.vlgmr.msra.gmra.mrb[0].mxu1 %vm155_vm6, %v137_v6 }
 0x109   :  { %485 = vmatprep.mubr.msk.f32.mxu1 %vm613_vm2, %v614_v5 }
 0x10c   :  { %486 = vmatmul.mubr.msk.f32.gmra.mrb[2].mxu1 %vm155_vm6, %v138_v10 }
 0x10d   :  { %488 = vmatprep.mubr.msk.f32.mxu1 %vm613_vm2, %v614_v5 }
 0x110   :  { %489 = vmatmul.mubr.msk.f32.gmra.mrb[4].mxu1 %vm155_vm6, %v139_v7 }
 0x1db   :  { %v232_v25 = vpop.f32.mrb[0].mxu1 }
 0x1dc   :  { %v484_v26 = vpop.f32.mrb[1].mxu1  ;;  %v233_v27 = vadd.f32 %v232_v25, %v143_v24 }
 0x1de   :  { %v246_v32 = vmax.f32 %v233_v27, 0.0 }
 0x1df   :  { %v237_v29 = vpop.f32.mrb[2].mxu1 }
 0x1e0   :  { %v238_v30 = vadd.f32 %v237_v29, %v148_v28  ;;  %v487_v31 = vpop.f32.mrb[3].mxu1 }
 0x1e2   :  { %v247_v33 = vmax.f32 %v238_v30, 0.0 }
 0x1e3   :  { %v242_v35 = vpop.f32.mrb[4].mxu1 }
 0x1e4   :  { %v511_v36 = vpack.c.bf16 %v247_v33, %v246_v32  ;;  %v243_v37 = vadd.f32 %v242_v35, %v153_v34  ;;  %v490_v38 = vpop.f32.mrb[5].mxu1 }
 0x1e6   :  { %v248_v39 = vmax.f32 %v243_v37, 0.0  ;;  %512 = vmatprep.subr.bf16.mxu0 %v511_v36 }
 0x1e7   :  { %514 = vmatpush3.bf16.msra.mxu0 %v511_v36 }
 0x1e8   :  { %495 = vmatprep.subr.msk.mxu0 %vm266_vm8, %v248_v39 }
 0x1eb   :  { %496 = vmatpush3.msk.msra.mxu0 %vm266_vm8, %v248_v39 }
 0x1ec   :  { %498 = vmatmul.mubr.msk.f32.vlgmr.msra.gmra.mrb[2].mxu0 %vm261_vm7, %v250_v23  ;;  %515 = vmatprep.subr.bf16.mxu0 %v612_v4 }
 0x1ed   :  { %504 = vmatprep.mubr.msk.f32.mxu0 %vm613_vm2, %v614_v5 }
 0x2bf   :  { %v499_v42 = vpop.f32.mrb[2].mxu0 }
 0x2c0   :  { %v342_v43 = vadd.f32 %v499_v42, %v259_v41  ;;  %v336_v44 = vpop.f32.mrb[3].mxu0 }
 0x2c1   :  { %v337_v45 = vadd.f32 %v336_v44, %v254_v40 }
 0x2c2   :  { %v346_v46 = vmax.f32 %v342_v43, 0.0 }
 0x2c3   :  { %v345_v47 = vmax.f32 %v337_v45, 0.0 }
 0x2c5   :  { %v516_v48 = vpack.c.bf16 %v346_v46, %v345_v47 }
 0x2c7   :  { %518 = vmatpush3.bf16.msk.msra.mxu0 %vm664_vm5, %v516_v48 }
 0x2ca   :  { %505 = vmatmul.mubr.msk.f32.vlgmr.msra.gmra.mrb[4].mxu0 %vm155_vm6, %v661_v9 }
 0x39d   :  { %v424_v50 = vpop.f32.mrb[4].mxu0 }
 0x39e   :  { %v425_v51 = vadd.f32 %v424_v50, %v351_v49  ;;  %v506_v52 = vpop.f32.mrb[5].mxu0 }
 0x3a0   :  { %428 = vst [vmem:[#allocation7] sm:$0x1] %v425_v51 }
 0x3a1   :  { %590 = shalt.err (!%p587_p6)
}
 0x3a2   :  { %s591_s11 = scalar_lea.hbm %s700_s2, 16 }
 0x3a3   :  { %p592_p7 = scmp.ne.s32.totalorder %s700_s2, %s591_s11  ;;  %p595_p8 = scmp.lt.u32.totalorder %s591_s11, %s700_s2 }
 0x3a5   :  { %p597_p9 = pnand %p595_p8, %p592_p7 }
 0x3a7   :  { %600 = shalt.err (!%p597_p9)
}
 0x3a8   :  { %438 = dma.vmem_to_hbm [thread:$0]  %s436_s6, 16, %s700_s2, [#allocation4]  }
 0x3a9   :  { %605 = dma.done.wait [#allocation4], 16  }
 0x3aa   :  { %606 = vsyncadd [#allocation4], 4294967280 }
 0x3ab   :  { %442 = vsyncpa [#allocation3], 1 }
 0x3ac   :  { %443 = vsyncpa [#allocation6], 1 }
 0x3ad   :  { %444 = vsyncpa [#allocation4], 1 }

</bundles_post_ra>
